<compile_context>
chip_gen: v6e
topology: v6e:2x2x1
jax: 0.10.0
libtpu: 0.0.40
codegen_flags: <defaults>
</compile_context>

<pallas_src>
import jax
import jax.numpy as jnp
from jax.experimental import pallas as pl
from jax.experimental.pallas import tpu as pltpu


def _round_up(x, m):
    return (x + m - 1) // m * m


def _vmem_limit_bytes():
    try:
        kind = jax.devices()[0].device_kind.lower()
    except Exception:
        kind = ""
    if "v7" in kind:
        return 40 << 20   # v7x: 64 MiB physical VMEM -> leave headroom
    return 64 << 20       # v5e / v6e: 128 MiB physical VMEM


def sage_kernel(a_ref, xk_ref, xi_ref, w_ref, b_ref, o_ref, acc_ref):
    """Grid = (row tiles i, reduction tiles k); k is the last (inner) axis.

    a_ref  : (TM, TK)    bf16 adjacency tile, A[i, j] = edge j -> i
    xk_ref : (TK, F+1)   bf16 neighbor features with a trailing ones column
    xi_ref : (TM, F)     f32 self features for the output rows
    w_ref  : (2F, D)     f32 full SAGEConv weight (resident)
    b_ref  : (1, D)      f32 bias (resident)
    o_ref  : (TM, D)     f32 output tile
    acc_ref: (TM, F+1)   f32 accumulator: [sum of neighbor features | degree]
    """
    k = pl.program_id(1)
    nk = pl.num_programs(1)

    @pl.when(k == 0)
    def _():
        acc_ref[...] = jnp.zeros_like(acc_ref)

    # Accumulate A_tile @ [X | 1] on the MXU (bf16 inputs, f32 accumulation).
    # The last column accumulates the in-degree "for free".
    acc_ref[...] += jnp.dot(a_ref[...], xk_ref[...],
                            preferred_element_type=jnp.float32)

    @pl.when(k == nk - 1)
    def _():
        F = xi_ref.shape[1]
        acc = acc_ref[...]                       # (TM, F+1)
        sum_x = acc[:, :F]                       # (TM, F)
        deg = acc[:, F:F + 1]                    # (TM, 1)
        # EUP reciprocal; the where-select keeps isolated nodes at exactly 0.
        inv_deg = jnp.where(deg > 0.0, pl.reciprocal(deg, approx=True), 0.0)
        agg = sum_x * inv_deg                    # mean over incoming neighbors

        # concat([x_i, agg]) @ W_full  ==  x_i @ W_self + agg @ W_neigh
        cat = jnp.concatenate([xi_ref[...], agg], axis=-1)     # (TM, 2F)
        out = jnp.dot(cat, w_ref[...], preferred_element_type=jnp.float32)
        out = out + b_ref[...]
        o_ref[...] = out.astype(o_ref.dtype)


def graphsage_forward(encodings, adjacency, weight, bias):
    """encodings: (N, F) f32, adjacency: (N, N), weight: (2F, D), bias: (D,)."""
    N, F = encodings.shape
    two_f, D = weight.shape
    assert two_f == 2 * F

    # ---- tiling: scales to large N, footprint fits v7x's 64 MiB VMEM ----
    N_pad = _round_up(N, 128)
    if N_pad <= 512:
        TM = TK = N_pad                      # small graph: one k step, few row tiles
    else:
        TM, TK = 256, 512                    # ~0.5 MiB of A per double-buffered tile
        N_pad = _round_up(N_pad, TK)

    F_aug = F + 1

    # ---- pad / cast at the call boundary ----
    x_f32 = jnp.zeros((N_pad, F), jnp.float32).at[:N, :].set(
        jnp.asarray(encodings, jnp.float32))
    a_bf16 = jnp.zeros((N_pad, N_pad), jnp.bfloat16).at[:N, :N].set(
        jnp.asarray(adjacency).astype(jnp.bfloat16))           # 0/1 exact in bf16
    x_aug = jnp.concatenate(
        [x_f32, jnp.ones((N_pad, 1), jnp.float32)], axis=1).astype(jnp.bfloat16)
    w = jnp.asarray(weight, jnp.float32)
    b = jnp.asarray(bias, jnp.float32).reshape(1, D)

    grid = (N_pad // TM, N_pad // TK)

    out = pl.pallas_call(
        sage_kernel,
        out_shape=jax.ShapeDtypeStruct((N_pad, D), jnp.float32),
        grid_spec=pltpu.PrefetchScalarGridSpec(
            num_scalar_prefetch=0,
            grid=grid,
            in_specs=[
                pl.BlockSpec((TM, TK), lambda i, k: (i, k)),        # A tile
                pl.BlockSpec((TK, F_aug), lambda i, k: (k, 0)),     # [X | 1] (bf16)
                pl.BlockSpec((TM, F), lambda i, k: (i, 0)),         # X self rows (f32)
                pl.BlockSpec((2 * F, D), lambda i, k: (0, 0)),      # W_full, resident
                pl.BlockSpec((1, D), lambda i, k: (0, 0)),          # bias, resident
            ],
            out_specs=pl.BlockSpec((TM, D), lambda i, k: (i, 0)),
            scratch_shapes=[pltpu.VMEM((TM, F_aug), jnp.float32)],
        ),
        compiler_params=pltpu.CompilerParams(
            dimension_semantics=("parallel", "arbitrary"),
            vmem_limit_bytes=_vmem_limit_bytes(),
        ),
    )(a_bf16, x_aug, x_f32, w, b)

    return out[:N]


def reference_forward(encodings, adjacency, weight, bias):
    """Pure-JAX reference matching the kernel's bf16 neighbor-feature path."""
    F = encodings.shape[1]
    w_self, w_neigh = weight[:F], weight[F:]
    a = adjacency.astype(jnp.float32)
    # the kernel feeds X to the A@X MXU pass in bf16
    x_bf = encodings.astype(jnp.bfloat16).astype(jnp.float32)
    deg = jnp.sum(a, axis=-1, keepdims=True)
    agg = jnp.where(deg > 0.0, (a @ x_bf) / jnp.maximum(deg, 1.0), 0.0)
    return encodings @ w_self + agg @ w_neigh + bias.reshape(1, -1)


if __name__ == "__main__":
    # Small shapes consistent with the module: encoding_dim=32, embedding_dim=128, N=16 nodes.
    N, ENC_DIM, EMB_DIM = 16, 32, 128

    key = jax.random.PRNGKey(0)
    k_x, k_a, k_w = jax.random.split(key, 3)

    encodings = jax.random.normal(k_x, (N, ENC_DIM), dtype=jnp.float32)

    # Dense adjacency stand-in for `subnetwork`: A[i, j] = 1.0 iff edge j -> i, no self loops.
    adjacency = (jax.random.uniform(k_a, (N, N)) < 0.3).astype(jnp.float32)
    adjacency = adjacency * (1.0 - jnp.eye(N, dtype=jnp.float32))

    # SAGEConv weight: (2*in_channels, out_channels), glorot-uniform; bias zeros.
    fan_in, fan_out = 2 * ENC_DIM, EMB_DIM
    limit = (6.0 / (fan_in + fan_out)) ** 0.5
    weight = jax.random.uniform(k_w, (2 * ENC_DIM, EMB_DIM), minval=-limit,
                                maxval=limit, dtype=jnp.float32)
    bias = jnp.zeros((EMB_DIM,), dtype=jnp.float32)

    out = graphsage_forward(encodings, adjacency, weight, bias)
    out = jax.block_until_ready(out)

    ref = reference_forward(encodings, adjacency, weight, bias)
    assert out.shape == (N, EMB_DIM)
    max_err = float(jnp.max(jnp.abs(out - ref)))
    assert jnp.allclose(out, ref, atol=1e-2, rtol=1e-2), f"max abs err {max_err}"

    print("KERNEL_OK")
</pallas_src>

<mosaic_0001>
module attributes {stable_mosaic.version = 11 : i64} {
  func.func @sage_kernel(%arg0: i32, %arg1: i32, %arg2: memref<128x128xbf16, #tpu.memory_space<vmem>>, %arg3: memref<128x33xbf16, #tpu.memory_space<vmem>>, %arg4: memref<128x32xf32, #tpu.memory_space<vmem>>, %arg5: memref<64x128xf32, #tpu.memory_space<vmem>>, %arg6: memref<1x128xf32, #tpu.memory_space<vmem>>, %arg7: memref<128x128xf32, #tpu.memory_space<vmem>>, %arg8: memref<128x33xf32, #tpu.memory_space<vmem>>) attributes {dimension_semantics = [#tpu.dimension_semantics<parallel>, #tpu.dimension_semantics<arbitrary>], iteration_bounds = array<i64: 1, 1>, scalar_prefetch = 0 : i64, scratch_operands = 1 : i64, tpu.core_type = #tpu.core_type<tc>, window_params = [{transform_indices = @transform_0, window_bounds = array<i64: 128, 128>}, {transform_indices = @transform_1, window_bounds = array<i64: 128, 33>}, {transform_indices = @transform_2, window_bounds = array<i64: 128, 32>}, {pipeline_mode = #tpu.pipeline_mode<synchronous>, transform_indices = @transform_3, window_bounds = array<i64: 64, 128>}, {pipeline_mode = #tpu.pipeline_mode<synchronous>, transform_indices = @transform_4, window_bounds = array<i64: 1, 128>}, {transform_indices = @transform_5, window_bounds = array<i64: 128, 128>}]} {
    %c0_i32 = arith.constant 0 : i32
    %0 = arith.cmpi eq, %arg1, %c0_i32 : i32
    %1 = arith.extui %0 : i1 to i32
    %c0_i32_0 = arith.constant 0 : i32
    %2 = arith.cmpi ne, %1, %c0_i32_0 : i32
    scf.if %2 {
      %cst_10 = arith.constant 0.000000e+00 : f32
      %12 = vector.broadcast %cst_10 : f32 to vector<128x33xf32>
      %c0_11 = arith.constant 0 : index
      %c0_12 = arith.constant 0 : index
      %13 = vector.load %arg8[%c0_11, %c0_12] : memref<128x33xf32, #tpu.memory_space<vmem>>, vector<128x33xf32>
      tpu.vector_store %arg8[%c0_11, %c0_12], %12 {strides = array<i32>} : memref<128x33xf32, #tpu.memory_space<vmem>>, vector<128x33xf32>,
    } else {
    }
    %c0 = arith.constant 0 : index
    %c0_1 = arith.constant 0 : index
    %3 = vector.load %arg8[%c0, %c0_1] : memref<128x33xf32, #tpu.memory_space<vmem>>, vector<128x33xf32>
    %c0_2 = arith.constant 0 : index
    %c0_3 = arith.constant 0 : index
    %4 = vector.load %arg2[%c0_2, %c0_3] : memref<128x128xbf16, #tpu.memory_space<vmem>>, vector<128x128xbf16>
    %c0_4 = arith.constant 0 : index
    %c0_5 = arith.constant 0 : index
    %5 = vector.load %arg3[%c0_4, %c0_5] : memref<128x33xbf16, #tpu.memory_space<vmem>>, vector<128x33xbf16>
    %cst = arith.constant dense<0.000000e+00> : vector<128x33xf32>
    %6 = tpu.matmul %4, %5, %cst {dimension_numbers = #tpu.dot_dimension_numbers<[1], [0], [0], [1], [0, 0, 1, 1], [], []>} : vector<128x128xbf16>, vector<128x33xbf16>, vector<128x33xf32> -> vector<128x33xf32>
    %7 = arith.addf %3, %6 : vector<128x33xf32>
    %c0_6 = arith.constant 0 : index
    %c0_7 = arith.constant 0 : index
    %8 = vector.load %arg8[%c0_6, %c0_7] : memref<128x33xf32, #tpu.memory_space<vmem>>, vector<128x33xf32>
    tpu.vector_store %arg8[%c0_6, %c0_7], %7 {strides = array<i32>} : memref<128x33xf32, #tpu.memory_space<vmem>>, vector<128x33xf32>,
    %c0_i32_8 = arith.constant 0 : i32
    %9 = arith.cmpi eq, %arg1, %c0_i32_8 : i32
    %10 = arith.extui %9 : i1 to i32
    %c0_i32_9 = arith.constant 0 : i32
    %11 = arith.cmpi ne, %10, %c0_i32_9 : i32
    scf.if %11 {
      %c0_10 = arith.constant 0 : index
      %c0_11 = arith.constant 0 : index
      %12 = vector.load %arg8[%c0_10, %c0_11] : memref<128x33xf32, #tpu.memory_space<vmem>>, vector<128x33xf32>
      %13 = vector.extract_strided_slice %12 {offsets = [0, 0], sizes = [128, 32], strides = [1, 1]} : vector<128x33xf32> to vector<128x32xf32>
      %14 = vector.extract_strided_slice %12 {offsets = [0, 32], sizes = [128, 1], strides = [1, 1]} : vector<128x33xf32> to vector<128x1xf32>
      %cst_12 = arith.constant 0.000000e+00 : f32
      %15 = vector.broadcast %cst_12 : f32 to vector<128x1xf32>
      %16 = arith.cmpf ogt, %14, %15 : vector<128x1xf32>
      %17 = tpu.reciprocal %14 {approx = true} : vector<128x1xf32> -> vector<128x1xf32>
      %cst_13 = arith.constant 0.000000e+00 : f32
      %18 = vector.broadcast %cst_13 : f32 to vector<128x1xf32>
      %19 = arith.select %16, %17, %18 : vector<128x1xi1>, vector<128x1xf32>
      %20 = vector.broadcast %19 : vector<128x1xf32> to vector<128x32xf32>
      %21 = arith.mulf %13, %20 : vector<128x32xf32>
      %c0_14 = arith.constant 0 : index
      %c0_15 = arith.constant 0 : index
      %22 = vector.load %arg4[%c0_14, %c0_15] : memref<128x32xf32, #tpu.memory_space<vmem>>, vector<128x32xf32>
      %23 = tpu.concatenate %22, %21 in 1 : vector<128x32xf32>, vector<128x32xf32> -> vector<128x64xf32>
      %c0_16 = arith.constant 0 : index
      %c0_17 = arith.constant 0 : index
      %24 = vector.load %arg5[%c0_16, %c0_17] : memref<64x128xf32, #tpu.memory_space<vmem>>, vector<64x128xf32>
      %cst_18 = arith.constant dense<0.000000e+00> : vector<128x128xf32>
      %25 = tpu.matmul %23, %24, %cst_18 {dimension_numbers = #tpu.dot_dimension_numbers<[1], [0], [0], [1], [0, 0, 1, 1], [], []>} : vector<128x64xf32>, vector<64x128xf32>, vector<128x128xf32> -> vector<128x128xf32>
      %c0_19 = arith.constant 0 : index
      %c0_20 = arith.constant 0 : index
      %26 = vector.load %arg6[%c0_19, %c0_20] : memref<1x128xf32, #tpu.memory_space<vmem>>, vector<1x128xf32>
      %27 = vector.broadcast %26 : vector<1x128xf32> to vector<128x128xf32>
      %28 = arith.addf %25, %27 : vector<128x128xf32>
      %c0_21 = arith.constant 0 : index
      %c0_22 = arith.constant 0 : index
      %29 = vector.load %arg7[%c0_21, %c0_22] : memref<128x128xf32, #tpu.memory_space<vmem>>, vector<128x128xf32>
      tpu.vector_store %arg7[%c0_21, %c0_22], %28 {strides = array<i32>} : memref<128x128xf32, #tpu.memory_space<vmem>>, vector<128x128xf32>,
    } else {
    }
    return
  }
  func.func @transform_0(%arg0: i32, %arg1: i32) -> (i32, i32) {
    %c0_i32 = arith.constant 0 : i32
    return %arg0, %arg1 : i32, i32
  }
  func.func @transform_1(%arg0: i32, %arg1: i32) -> (i32, i32) {
    %c0_i32 = arith.constant 0 : i32
    %c0_i32_0 = arith.constant 0 : i32
    return %arg1, %c0_i32 : i32, i32
  }
  func.func @transform_2(%arg0: i32, %arg1: i32) -> (i32, i32) {
    %c0_i32 = arith.constant 0 : i32
    %c0_i32_0 = arith.constant 0 : i32
    return %arg0, %c0_i32 : i32, i32
  }
  func.func @transform_3(%arg0: i32, %arg1: i32) -> (i32, i32) {
    %c0_i32 = arith.constant 0 : i32
    %c0_i32_0 = arith.constant 0 : i32
    %c0_i32_1 = arith.constant 0 : i32
    return %c0_i32, %c0_i32_0 : i32, i32
  }
  func.func @transform_4(%arg0: i32, %arg1: i32) -> (i32, i32) {
    %c0_i32 = arith.constant 0 : i32
    %c0_i32_0 = arith.constant 0 : i32
    %c0_i32_1 = arith.constant 0 : i32
    return %c0_i32, %c0_i32_0 : i32, i32
  }
  func.func @transform_5(%arg0: i32, %arg1: i32) -> (i32, i32) {
    %c0_i32 = arith.constant 0 : i32
    %c0_i32_0 = arith.constant 0 : i32
    return %arg0, %c0_i32 : i32, i32
  }
}

</mosaic_0001>

<bundles_post_ra>
// kernel: tpu_custom_call.1
= control target key start
LH: loop header
LB: loop body
LE: loop exit
PB: predicated region body
PF: predicated region fallthrough
CT: control target
= control target key end

     0   :  { %vm26_vm0 = vcmask 269312   ;;  %v1041_v2 = vmov 0.0   ;;  %s1363_s0 = inlined_call_operand.vmem [shape: bf16[128,128], index: 0, kind: input, shape index: {}]   ;;  %s1364_s1 = inlined_call_operand.vmem [shape: bf16[128,33], index: 1, kind: input, shape index: {}]   ;;  %s1365_s2 = inlined_call_operand.vmem [shape: f32[128,32], index: 2, kind: input, shape index: {}]   ;;  %s1366_s3 = inlined_call_operand.vmem [shape: f32[64,128], index: 3, kind: input, shape index: {}]   ;;  %s1367_s4 = inlined_call_operand.vmem [shape: f32[1,128], index: 4, kind: input, shape index: {}]   ;;  %s1368_s5 = inlined_call_operand.hbm [shape: f32[128,128], index: 5, kind: output, shape index: {}]  }
   0x1   :  { %v971_v0 = vld [vmem:[%s1364_s1 + $0x38] sm:$0xff]   ;;  %v972_v1 = vld [vmem:[%s1364_s1 + $0x30] sm:$0xff]   ;;  %29 = vst.msk [vmem:[#allocation2 + $0x10] sm:$0xff] %vm26_vm0, %v1041_v2  ;;  %27 = vst.msk [vmem:[#allocation2] sm:$0xff] %vm26_vm0, %v1041_v2 }
   0x2   :  { %891 = vmatprep.subr.bf16.mxu0 %v971_v0  ;;  %28 = vst.msk [vmem:[#allocation2 + $0x8] sm:$0xff] %vm26_vm0, %v1041_v2  ;;  %30 = vst.msk [vmem:[#allocation2 + $0x18] sm:$0xff] %vm26_vm0, %v1041_v2  ;;  %v973_v3 = vld [vmem:[%s1364_s1 + $0x28] sm:$0xff]   ;;  %v974_v4 = vld [vmem:[%s1364_s1 + $0x20] sm:$0xff]  }
   0x3   :  { %31 = vst.msk [vmem:[#allocation2 + $0x20] sm:$0xff] %vm26_vm0, %v1041_v2  ;;  %32 = vst.msk [vmem:[#allocation2 + $0x28] sm:$0xff] %vm26_vm0, %v1041_v2  ;;  %892 = vmatpush3.bf16.msra.mxu0 %v971_v0  ;;  %v979_v5 = vld [vmem:[%s1363_s0] sm:$0xff]   ;;  %v975_v6 = vld [vmem:[%s1364_s1 + $0x18] sm:$0xff]  }
   0x4   :  { %33 = vst.msk [vmem:[#allocation2 + $0x30] sm:$0xff] %vm26_vm0, %v1041_v2  ;;  %34 = vst.msk [vmem:[#allocation2 + $0x38] sm:$0xff] %vm26_vm0, %v1041_v2  ;;  %893 = vmatprep.subr.bf16.mxu0 %v972_v1  ;;  %907 = vmatprep.mubr.bf16.mxu0 %v979_v5  ;;  %v976_v7 = vld [vmem:[%s1364_s1 + $0x10] sm:$0xff]  }
   0x5   :  { %35 = vst.msk [vmem:[#allocation2 + $0x40] sm:$0xff] %vm26_vm0, %v1041_v2  ;;  %36 = vst.msk [vmem:[#allocation2 + $0x48] sm:$0xff] %vm26_vm0, %v1041_v2 }
   0x6   :  { %37 = vst.msk [vmem:[#allocation2 + $0x50] sm:$0xff] %vm26_vm0, %v1041_v2  ;;  %38 = vst.msk [vmem:[#allocation2 + $0x58] sm:$0xff] %vm26_vm0, %v1041_v2 }
   0x7   :  { %39 = vst.msk [vmem:[#allocation2 + $0x60] sm:$0xff] %vm26_vm0, %v1041_v2  ;;  %40 = vst.msk [vmem:[#allocation2 + $0x68] sm:$0xff] %vm26_vm0, %v1041_v2  ;;  %894 = vmatpush3.bf16.msra.mxu0 %v972_v1 }
   0x8   :  { %41 = vst.msk [vmem:[#allocation2 + $0x70] sm:$0xff] %vm26_vm0, %v1041_v2  ;;  %42 = vst.msk [vmem:[#allocation2 + $0x78] sm:$0xff] %vm26_vm0, %v1041_v2  ;;  %895 = vmatprep.subr.bf16.mxu0 %v973_v3 }
   0xb   :  { %896 = vmatpush3.bf16.msra.mxu0 %v973_v3 }
   0xc   :  { %897 = vmatprep.subr.bf16.mxu0 %v974_v4 }
   0xf   :  { %898 = vmatpush3.bf16.msra.mxu0 %v974_v4 }
  0x10   :  { %899 = vmatprep.subr.bf16.mxu0 %v975_v6 }
  0x11   :  { %10 = vsyncpa [#allocation4], 0  ;;  %v977_v8 = vld [vmem:[%s1364_s1 + $0x8] sm:$0xff]   ;;  %v978_v9 = vld [vmem:[%s1364_s1] sm:$0xff]   ;;  %v1042_v17 = vmov 32   ;;  %s1043_s14 = smov 32  }
  0x12   :  { %v980_v10 = vld [vmem:[%s1363_s0 + $0x8] sm:$0xff]   ;;  %v981_v11 = vld [vmem:[%s1363_s0 + $0x10] sm:$0xff]   ;;  %v982_v12 = vld [vmem:[%s1363_s0 + $0x18] sm:$0xff]   ;;  %970 = vset.pattern.permute.xlu1 %v1042_v17  ;;  %969 = vset.pattern.permute.xlu0 %v1042_v17 }
  0x13   :  { %900 = vmatpush3.bf16.msra.mxu0 %v975_v6  ;;  %v983_v13 = vld [vmem:[%s1363_s0 + $0x20] sm:$0xff]   ;;  %v984_v14 = vld [vmem:[%s1363_s0 + $0x28] sm:$0xff]   ;;  %v985_v15 = vld [vmem:[%s1363_s0 + $0x30] sm:$0xff]  }
  0x14   :  { %901 = vmatprep.subr.bf16.mxu0 %v976_v7  ;;  %v986_v16 = vld [vmem:[%s1363_s0 + $0x38] sm:$0xff]   ;;  %v45_v18 = vld [vmem:[#allocation2 + $0x10] sm:$0xff]  ;;  %v43_v20 = vld [vmem:[#allocation2] sm:$0xff] }
  0x15   :  { %v46_v23 = vld [vmem:[#allocation2 + $0x18] sm:$0xff]  ;;  %v44_v26 = vld [vmem:[#allocation2 + $0x8] sm:$0xff]  ;;  %v49_v29 = vld [vmem:[#allocation2 + $0x30] sm:$0xff] }
  0x16   :  { %v47_v32 = vld [vmem:[#allocation2 + $0x20] sm:$0xff]  ;;  %v50_v35 = vld [vmem:[#allocation2 + $0x38] sm:$0xff]  ;;  %v48_v39 = vld [vmem:[#allocation2 + $0x28] sm:$0xff] }
  0x17   :  { %902 = vmatpush3.bf16.msra.mxu0 %v976_v7  ;;  %v53_v43 = vld [vmem:[#allocation2 + $0x50] sm:$0xff]  ;;  %v51_v47 = vld [vmem:[#allocation2 + $0x40] sm:$0xff]  ;;  %v54_v51 = vld [vmem:[#allocation2 + $0x58] sm:$0xff] }
  0x18   :  { %903 = vmatprep.subr.bf16.mxu0 %v977_v8  ;;  %v52_v54 = vld [vmem:[#allocation2 + $0x48] sm:$0xff]  ;;  %v57_v59 = vld [vmem:[#allocation2 + $0x70] sm:$0xff]  ;;  %v55_v63 = vld [vmem:[#allocation2 + $0x60] sm:$0xff] }
  0x19   :  { %v58_v6 = vld [vmem:[#allocation2 + $0x78] sm:$0xff] }
  0x1b   :  { %904 = vmatpush3.bf16.msra.mxu0 %v977_v8 }
  0x1c   :  { %905 = vmatprep.subr.bf16.mxu0 %v978_v9 }
  0x1f   :  { %906 = vmatpush3.bf16.msra.mxu0 %v978_v9 }
  0x22   :  { %908 = vmatmul.mubr.bf16.vlgmr.msra.gmra.mxu0 %v980_v10 }
  0x23   :  { %911 = vmatprep.mubr.bf16.mxu0 %v981_v11  ;;  %v56_v11 = vld [vmem:[#allocation2 + $0x68] sm:$0xff] }
  0x2a   :  { %912 = vmatmul.mubr.bf16.gmra.mxu0 %v982_v12 }
  0x2b   :  { %915 = vmatprep.mubr.bf16.mxu0 %v983_v13 }
  0x32   :  { %916 = vmatmul.mubr.bf16.gmra.mxu0 %v984_v14 }
  0x33   :  { %919 = vmatprep.mubr.bf16.mxu0 %v985_v15 }
  0x3a   :  { %920 = vmatmul.mubr.bf16.gmra.mxu0 %v986_v16 }
  0xe2   :  { %v909_v19 = vpop.f32.mrf.mxu0 }
  0xe3   :  { %v286_v21 = vadd.f32 %v909_v19, %v45_v18 }
  0xe4   :  { %v221_v22 = vpop.f32.mrf.mxu0 }
  0xe5   :  { %303 = vst.msk [vmem:[#allocation2 + $0x10] sm:$0xff] %vm26_vm0, %v286_v21  ;;  %v284_v24 = vadd.f32 %v221_v22, %v43_v20 }
  0xe6   :  { %v910_v25 = vpop.f32.mrf.mxu0 }
  0xe7   :  { %301 = vst.msk [vmem:[#allocation2] sm:$0xff] %vm26_vm0, %v284_v24  ;;  %v287_v27 = vadd.f32 %v910_v25, %v46_v23 }
  0xe8   :  { %v224_v28 = vpop.f32.mrf.mxu0 }
  0xe9   :  { %304 = vst.msk [vmem:[#allocation2 + $0x18] sm:$0xff] %vm26_vm0, %v287_v27  ;;  %v285_v30 = vadd.f32 %v224_v28, %v44_v26 }
  0xea   :  { %v913_v31 = vpop.f32.mrf.mxu0 }
  0xeb   :  { %302 = vst.msk [vmem:[#allocation2 + $0x8] sm:$0xff] %vm26_vm0, %v285_v30  ;;  %v290_v33 = vadd.f32 %v913_v31, %v49_v29 }
  0xec   :  { %v237_v34 = vpop.f32.mrf.mxu0  ;;  %v1145_v36 = vld [vmem:[#allocation2 + $0x10] sm:$0xff] }
  0xed   :  { %307 = vst.msk [vmem:[#allocation2 + $0x30] sm:$0xff] %vm26_vm0, %v290_v33  ;;  %v288_v37 = vadd.f32 %v237_v34, %v47_v32  ;;  %987 = vrcp.f32 %v1145_v36  ;;  %vm338_vm1 = vcmp.gt.f32.partialorder %v1145_v36, 0.0 }
  0xee   :  { %v914_v38 = vpop.f32.mrf.mxu0  ;;  %v1149_v40 = vld [vmem:[#allocation2] sm:$0xff] }
  0xef   :  { %305 = vst.msk [vmem:[#allocation2 + $0x20] sm:$0xff] %vm26_vm0, %v288_v37  ;;  %v291_v41 = vadd.f32 %v914_v38, %v50_v35  ;;  %989 = vrcp.f32 %v1149_v40  ;;  %vm336_vm2 = vcmp.gt.f32.partialorder %v1149_v40, 0.0 }
  0xf0   :  { %v240_v42 = vpop.f32.mrf.mxu0  ;;  %v1153_v44 = vld [vmem:[#allocation2 + $0x18] sm:$0xff] }
  0xf1   :  { %308 = vst.msk [vmem:[#allocation2 + $0x38] sm:$0xff] %vm26_vm0, %v291_v41  ;;  %v289_v45 = vadd.f32 %v240_v42, %v48_v39  ;;  %991 = vrcp.f32 %v1153_v44  ;;  %vm339_vm3 = vcmp.gt.f32.partialorder %v1153_v44, 0.0 }
  0xf2   :  { %v917_v46 = vpop.f32.mrf.mxu0  ;;  %v1157_v48 = vld [vmem:[#allocation2 + $0x8] sm:$0xff] }
  0xf3   :  { %306 = vst.msk [vmem:[#allocation2 + $0x28] sm:$0xff] %vm26_vm0, %v289_v45  ;;  %v294_v49 = vadd.f32 %v917_v46, %v53_v43  ;;  %993 = vrcp.f32 %v1157_v48  ;;  %vm337_vm4 = vcmp.gt.f32.partialorder %v1157_v48, 0.0 }
  0xf4   :  { %v253_v50 = vpop.f32.mrf.mxu0  ;;  %v1164_v56 = vld [vmem:[#allocation2 + $0x30] sm:$0xff] }
  0xf5   :  { %311 = vst.msk [vmem:[#allocation2 + $0x50] sm:$0xff] %vm26_vm0, %v294_v49  ;;  %v292_v52 = vadd.f32 %v253_v50, %v51_v47  ;;  %vm342_vm7 = vcmp.gt.f32.partialorder %v1164_v56, 0.0 }
  0xf6   :  { %v918_v53 = vpop.f32.mrf.mxu0  ;;  %v1162_v55 = vld [vmem:[#allocation2 + $0x20] sm:$0xff] }
  0xf7   :  { %309 = vst.msk [vmem:[#allocation2 + $0x40] sm:$0xff] %vm26_vm0, %v292_v52  ;;  %v295_v57 = vadd.f32 %v918_v53, %v54_v51  ;;  %995 = vrcp.f32 %v1162_v55  ;;  %vm340_vm5 = vcmp.gt.f32.partialorder %v1162_v55, 0.0  ;;  %v584_v53 = vld [vmem:[%s1366_s3 + $0x38] sm:$0xff] }
  0xf8   :  { %v256_v58 = vpop.f32.mrf.mxu0  ;;  %997 = vrcp.f32 %v1164_v56  ;;  %v1173_v1 = vld [vmem:[#allocation2 + $0x38] sm:$0xff]  ;;  %923 = vmatprep.subr.mxu1 %v584_v53 }
  0xf9   :  { %312 = vst.msk [vmem:[#allocation2 + $0x58] sm:$0xff] %vm26_vm0, %v295_v57  ;;  %v293_v60 = vadd.f32 %v256_v58, %v52_v54  ;;  %vm343_vm8 = vcmp.gt.f32.partialorder %v1173_v1, 0.0  ;;  %v583_v54 = vld [vmem:[%s1366_s3 + $0x30] sm:$0xff]  ;;  %924 = vmatpush3.msra.mxu1 %v584_v53  ;;  %v582_v58 = vld [vmem:[%s1366_s3 + $0x28] sm:$0xff] }
  0xfa   :  { %v988_v61 = vpop.eup %987  ;;  %v921_v62 = vpop.f32.mrf.mxu0  ;;  %v1171_v0 = vld [vmem:[#allocation2 + $0x28] sm:$0xff]  ;;  %925 = vmatprep.subr.mxu1 %v583_v54 }
  0xfb   :  { %310 = vst.msk [vmem:[#allocation2 + $0x48] sm:$0xff] %vm26_vm0, %v293_v60  ;;  %v298_v2 = vadd.f32 %v921_v62, %v57_v59  ;;  %v370_v3 = vsel %vm338_vm1, %v988_v61, 0.0  ;;  %999 = vrcp.f32 %v1171_v0  ;;  %vm341_vm6 = vcmp.gt.f32.partialorder %v1171_v0, 0.0  ;;  %926 = vmatpush3.msra.mxu1 %v583_v54  ;;  %v581_v59 = vld [vmem:[%s1366_s3 + $0x20] sm:$0xff]  ;;  %v580_v60 = vld [vmem:[%s1366_s3 + $0x18] sm:$0xff]  ;;  %v579_v61 = vld [vmem:[%s1366_s3 + $0x10] sm:$0xff] }
  0xfc   :  { %v990_v4 = vpop.eup %989  ;;  %v269_v5 = vpop.f32.mrf.mxu0  ;;  %396 = vperm.xlu1 %970, %v370_v3   ;;  %1001 = vrcp.f32 %v1173_v1  ;;  %v1183_v13 = vld [vmem:[#allocation2 + $0x50] sm:$0xff]  ;;  %927 = vmatprep.subr.mxu1 %v582_v58  ;;  %v578_v62 = vld [vmem:[%s1366_s3 + $0x8] sm:$0xff]  ;;  %vm560_vm1 = vcmask 261120  }
  0xfd   :  { %315 = vst.msk [vmem:[#allocation2 + $0x70] sm:$0xff] %vm26_vm0, %v298_v2  ;;  %v296_v7 = vadd.f32 %v269_v5, %v55_v63  ;;  %v368_v8 = vsel %vm336_vm2, %v990_v4, 0.0  ;;  %vm346_vm11 = vcmp.gt.f32.partialorder %v1183_v13, 0.0  ;;  %928 = vmatpush3.msra.mxu1 %v582_v58  ;;  %v577_v63 = vld [vmem:[%s1366_s3] sm:$0xff]  ;;  %vm592_vm2 = vcmask 523264  }
  0xfe   :  { %v992_v9 = vpop.eup %991  ;;  %v922_v10 = vpop.f32.mrf.mxu0  ;;  %386 = vperm.xlu0 %969, %v368_v8   ;;  %v1181_v12 = vld [vmem:[#allocation2 + $0x40] sm:$0xff]  ;;  %929 = vmatprep.subr.mxu1 %v581_v59 }
  0xff   :  { %313 = vst.msk [vmem:[#allocation2 + $0x60] sm:$0xff] %vm26_vm0, %v296_v7  ;;  %v299_v14 = vadd.f32 %v922_v10, %v58_v6  ;;  %v371_v15 = vsel %vm339_vm3, %v992_v9, 0.0  ;;  %1003 = vrcp.f32 %v1181_v12  ;;  %vm344_vm9 = vcmp.gt.f32.partialorder %v1181_v12, 0.0  ;;  %930 = vmatpush3.msra.mxu1 %v581_v59  ;;  %v489_v59 = vld [vmem:[%s1365_s2 + $0x48] sm:$0xff] }
 0x100   :  { %v994_v16 = vpop.eup %993  ;;  %v272_v17 = vpop.f32.mrf.mxu0  ;;  %401 = vperm.xlu1 %970, %v371_v15   ;;  %1005 = vrcp.f32 %v1183_v13  ;;  %v1192_v21 = vld [vmem:[#allocation2 + $0x58] sm:$0xff]  ;;  %931 = vmatprep.subr.mxu1 %v580_v60 }
 0x101   :  { %316 = vst.msk [vmem:[#allocation2 + $0x78] sm:$0xff] %vm26_vm0, %v299_v14  ;;  %v297_v18 = vadd.f32 %v272_v17, %v56_v11  ;;  %v369_v19 = vsel %vm337_vm4, %v994_v16, 0.0  ;;  %vm347_vm12 = vcmp.gt.f32.partialorder %v1192_v21, 0.0  ;;  %932 = vmatpush3.msra.mxu1 %v580_v60  ;;  %v490_v60 = vld [vmem:[%s1365_s2 + $0x50] sm:$0xff] }
 0x102   :  { %391 = vperm.xlu0 %969, %v369_v19   ;;  %v1190_v20 = vld [vmem:[#allocation2 + $0x48] sm:$0xff]  ;;  %933 = vmatprep.subr.mxu1 %v579_v61 }
 0x103   :  { %314 = vst.msk [vmem:[#allocation2 + $0x68] sm:$0xff] %vm26_vm0, %v297_v18  ;;  %1007 = vrcp.f32 %v1190_v20  ;;  %vm345_vm10 = vcmp.gt.f32.partialorder %v1190_v20, 0.0  ;;  %934 = vmatpush3.msra.mxu1 %v579_v61 }
 0x104   :  { %v996_v22 = vpop.eup %995  ;;  %1009 = vrcp.f32 %v1192_v21  ;;  %v1200_v26 = vld [vmem:[#allocation2 + $0x70] sm:$0xff]  ;;  %935 = vmatprep.subr.mxu1 %v578_v62 }
 0x105   :  { %v372_v23 = vsel %vm340_vm5, %v996_v22, 0.0  ;;  %v998_v24 = vpop.eup %997  ;;  %vm350_vm15 = vcmp.gt.f32.partialorder %v1200_v26, 0.0  ;;  %936 = vmatpush3.msra.mxu1 %v578_v62 }
 0x106   :  { %406 = vperm.xlu0 %969, %v372_v23   ;;  %v1198_v25 = vld [vmem:[#allocation2 + $0x60] sm:$0xff]  ;;  %v374_v29 = vsel %vm342_vm7, %v998_v24, 0.0  ;;  %937 = vmatprep.subr.mxu1 %v577_v63 }
 0x107   :  { %1011 = vrcp.f32 %v1198_v25  ;;  %vm348_vm13 = vcmp.gt.f32.partialorder %v1198_v25, 0.0  ;;  %938 = vmatpush3.msra.mxu1 %v577_v63 }
 0x108   :  { %v1000_v27 = vpop.eup %999  ;;  %1013 = vrcp.f32 %v1200_v26  ;;  %v1208_v32 = vld [vmem:[#allocation2 + $0x78] sm:$0xff] }
 0x109   :  { %v373_v28 = vsel %vm341_vm6, %v1000_v27, 0.0  ;;  %v1002_v30 = vpop.eup %1001  ;;  %vm351_vm0 = vcmp.gt.f32.partialorder %v1208_v32, 0.0 }
 0x10a   :  { %411 = vperm.xlu1 %970, %v373_v28   ;;  %416 = vperm.xlu0 %969, %v374_v29   ;;  %v1206_v31 = vld [vmem:[#allocation2 + $0x68] sm:$0xff]  ;;  %v375_v34 = vsel %vm343_vm8, %v1002_v30, 0.0  ;;  %v482_v30 = vld [vmem:[%s1365_s2 + $0x10] sm:$0xff] }
 0x10b   :  { %1015 = vrcp.f32 %v1206_v31  ;;  %vm349_vm14 = vcmp.gt.f32.partialorder %v1206_v31, 0.0 }
 0x10c   :  { %v1004_v33 = vpop.eup %1003  ;;  %1017 = vrcp.f32 %v1208_v32 }
 0x10d   :  { %v376_v35 = vsel %vm344_vm9, %v1004_v33, 0.0  ;;  %v1006_v37 = vpop.eup %1005 }
 0x10e   :  { %421 = vperm.xlu1 %970, %v375_v34   ;;  %426 = vperm.xlu0 %969, %v376_v35   ;;  %v378_v41 = vsel %vm346_vm11, %v1006_v37, 0.0  ;;  %v483_v35 = vld [vmem:[%s1365_s2 + $0x18] sm:$0xff]  ;;  %v484_v37 = vld [vmem:[%s1365_s2 + $0x20] sm:$0xff] }
 0x110   :  { %v1008_v38 = vpop.eup %1007 }
 0x111   :  { %v377_v39 = vsel %vm345_vm10, %v1008_v38, 0.0  ;;  %v1010_v42 = vpop.eup %1009 }
 0x112   :  { %431 = vperm.xlu1 %970, %v377_v39   ;;  %436 = vperm.xlu0 %969, %v378_v41   ;;  %v379_v45 = vsel %vm347_vm12, %v1010_v42, 0.0 }
 0x114   :  { %v1012_v43 = vpop.eup %1011 }
 0x115   :  { %v380_v46 = vsel %vm348_vm13, %v1012_v43, 0.0  ;;  %v1014_v47 = vpop.eup %1013  ;;  %v485_v43 = vld [vmem:[%s1365_s2 + $0x28] sm:$0xff] }
 0x116   :  { %441 = vperm.xlu1 %970, %v379_v45   ;;  %446 = vperm.xlu0 %969, %v380_v46   ;;  %v382_v51 = vsel %vm350_vm15, %v1014_v47, 0.0  ;;  %v486_v45 = vld [vmem:[%s1365_s2 + $0x30] sm:$0xff] }
 0x118   :  { %v1016_v49 = vpop.eup %1015 }
 0x119   :  { %v381_v50 = vsel %vm349_vm14, %v1016_v49, 0.0  ;;  %v1018_v52 = vpop.eup %1017 }
 0x11a   :  { %451 = vperm.xlu1 %970, %v381_v50   ;;  %456 = vperm.xlu0 %969, %v382_v51   ;;  %v383_v57 = vsel %vm351_vm0, %v1018_v52, 0.0  ;;  %v487_v51 = vld [vmem:[%s1365_s2 + $0x38] sm:$0xff]  ;;  %v488_v52 = vld [vmem:[%s1365_s2 + $0x40] sm:$0xff] }
 0x11e   :  { %461 = vperm.xlu1 %970, %v383_v57  }
 0x177   :  { %v397_v2 = vpop.permute.xlu1 %396 }
 0x178   :  { %v466_v6 = vmul.f32 %v397_v2, %v1145_v36 }
 0x179   :  { %v387_v3 = vpop.permute.xlu0 %386 }
 0x17a   :  { %v464_v4 = vmul.f32 %v387_v3, %v1149_v40  ;;  %v491_v3 = vld [vmem:[%s1365_s2 + $0x58] sm:$0xff] }
 0x17b   :  { %v402_v8 = vpop.permute.xlu1 %401 }
 0x17c   :  { %512 = vrot.lane.b32.xlu0 %v464_v4, %s1043_s14  ;;  %v467_v10 = vmul.f32 %v402_v8, %v1153_v44  ;;  %v492_v4 = vld [vmem:[%s1365_s2 + $0x60] sm:$0xff] }
 0x17d   :  { %v392_v5 = vpop.permute.xlu0 %391 }
 0x17e   :  { %v465_v7 = vmul.f32 %v392_v5, %v1157_v48 }
 0x180   :  { %516 = vrot.lane.b32.xlu0 %v466_v6, %s1043_s14  ;;  %514 = vrot.lane.b32.xlu1 %v465_v7, %s1043_s14 }
 0x181   :  { %v407_v9 = vpop.permute.xlu0 %406 }
 0x182   :  { %v468_v11 = vmul.f32 %v407_v9, %v1162_v55  ;;  %v493_v9 = vld [vmem:[%s1365_s2 + $0x68] sm:$0xff] }
 0x184   :  { %518 = vrot.lane.b32.xlu1 %v467_v10, %s1043_s14  ;;  %520 = vrot.lane.b32.xlu0 %v468_v11, %s1043_s14  ;;  %v494_v10 = vld [vmem:[%s1365_s2 + $0x70] sm:$0xff] }
 0x185   :  { %v412_v40 = vpop.permute.xlu1 %411  ;;  %v417_v14 = vpop.permute.xlu0 %416 }
 0x186   :  { %v469_v36 = vmul.f32 %v412_v40, %v1171_v0  ;;  %v470_v48 = vmul.f32 %v417_v14, %v1164_v56 }
 0x188   :  { %522 = vrot.lane.b32.xlu1 %v469_v36, %s1043_s14  ;;  %524 = vrot.lane.b32.xlu0 %v470_v48, %s1043_s14  ;;  %v495_v48 = vld [vmem:[%s1365_s2 + $0x78] sm:$0xff] }
 0x189   :  { %v422_v15 = vpop.permute.xlu1 %421  ;;  %v427_v16 = vpop.permute.xlu0 %426 }
 0x18a   :  { %v471_v44 = vmul.f32 %v422_v15, %v1173_v1  ;;  %v472_v55 = vmul.f32 %v427_v16, %v1181_v12 }
 0x18c   :  { %526 = vrot.lane.b32.xlu1 %v471_v44, %s1043_s14  ;;  %528 = vrot.lane.b32.xlu0 %v472_v55, %s1043_s14  ;;  %v834_v44 = vld [vmem:[%s1367_s4] ss:$0 sm:$0xff] }
 0x18d   :  { %v432_v17 = vpop.permute.xlu1 %431  ;;  %v437_v18 = vpop.permute.xlu0 %436 }
 0x18e   :  { %v473_v0 = vmul.f32 %v432_v17, %v1190_v20  ;;  %v474_v56 = vmul.f32 %v437_v18, %v1183_v13 }
 0x190   :  { %530 = vrot.lane.b32.xlu1 %v473_v0, %s1043_s14  ;;  %532 = vrot.lane.b32.xlu0 %v474_v56, %s1043_s14 }
 0x191   :  { %v442_v19 = vpop.permute.xlu1 %441  ;;  %v447_v22 = vpop.permute.xlu0 %446 }
 0x192   :  { %v475_v1 = vmul.f32 %v442_v19, %v1192_v21  ;;  %v476_v12 = vmul.f32 %v447_v22, %v1198_v25  ;;  %v480_v21 = vld [vmem:[%s1365_s2] sm:$0xff] }
 0x194   :  { %534 = vrot.lane.b32.xlu1 %v475_v1, %s1043_s14  ;;  %536 = vrot.lane.b32.xlu0 %v476_v12, %s1043_s14 }
 0x195   :  { %v452_v23 = vpop.permute.xlu1 %451  ;;  %v457_v24 = vpop.permute.xlu0 %456 }
 0x196   :  { %v477_v20 = vmul.f32 %v452_v23, %v1206_v31  ;;  %v478_v13 = vmul.f32 %v457_v24, %v1200_v26  ;;  %v481_v26 = vld [vmem:[%s1365_s2 + $0x8] sm:$0xff]  ;;  %s1044_s2 = smov [#allocation3]  }
 0x197   :  { %s807_s4 = sshll.u32 %s1044_s2, 4  ;;  %s808_s4 = int_to_ptr.vmem [resolvable:$true] %s807_s4 }
 0x198   :  { %538 = vrot.lane.b32.xlu1 %v477_v20, %s1043_s14  ;;  %540 = vrot.lane.b32.xlu0 %v478_v13, %s1043_s14  ;;  %s1019_s19 = scalar_lea.vmem %s808_s4, 2048  ;;  %p1024_p1 = scmp.lt.s32.totalorder %s808_s4, %s808_s4 }
 0x199   :  { %v462_v27 = vpop.permute.xlu1 %461  ;;  %p1020_p0 = scmp.ne.s32.totalorder %s808_s4, %s1019_s19  ;;  %p1025_p2 = scmp.lt.s32.totalorder %s1019_s19, %s1019_s19 }
 0x19a   :  { %v479_v28 = vmul.f32 %v462_v27, %v1208_v32 }
 0x19b   :  { %p1026_p3 = por %p1025_p2, %p1024_p1 }
 0x19c   :  { %542 = vrot.lane.b32.xlu1 %v479_v28, %s1043_s14 }
 0x19d   :  { %p1027_p4 = pnand %p1026_p3, %p1020_p0 }
 0x1ee   :  { %v513_v25 = vpop.permute.xlu0 %512 }
 0x1ef   :  { %v561_v29 = vsel %vm560_vm1, %v480_v21, %v513_v25 }
 0x1f0   :  { %939 = vmatprep.mubr.msk.f32.mxu1 %vm592_vm2, %v561_v29 }
 0x1f2   :  { %v515_v31 = vpop.permute.xlu1 %514  ;;  %v517_v32 = vpop.permute.xlu0 %516 }
 0x1f3   :  { %v562_v33 = vsel %vm560_vm1, %v481_v26, %v515_v31  ;;  %v563_v34 = vsel %vm560_vm1, %v482_v30, %v517_v32 }
 0x1f4   :  { %940 = vmatmul.mubr.msk.f32.vlgmr.msra.gmra.mxu1 %vm592_vm2, %v562_v33 }
 0x1f5   :  { %942 = vmatprep.mubr.msk.f32.mxu1 %vm592_vm2, %v563_v34 }
 0x1f6   :  { %v519_v38 = vpop.permute.xlu1 %518  ;;  %v521_v39 = vpop.permute.xlu0 %520 }
 0x1f7   :  { %v564_v41 = vsel %vm560_vm1, %v483_v35, %v519_v38  ;;  %v565_v42 = vsel %vm560_vm1, %v484_v37, %v521_v39 }
 0x1f8   :  { %943 = vmatmul.mubr.msk.f32.gmra.mxu1 %vm592_vm2, %v564_v41 }
 0x1f9   :  { %945 = vmatprep.mubr.msk.f32.mxu1 %vm592_vm2, %v565_v42 }
 0x1fa   :  { %v523_v46 = vpop.permute.xlu1 %522  ;;  %v525_v47 = vpop.permute.xlu0 %524 }
 0x1fb   :  { %v566_v49 = vsel %vm560_vm1, %v485_v43, %v523_v46  ;;  %v567_v50 = vsel %vm560_vm1, %v486_v45, %v525_v47 }
 0x1fc   :  { %946 = vmatmul.mubr.msk.f32.gmra.mxu1 %vm592_vm2, %v566_v49 }
 0x1fd   :  { %948 = vmatprep.mubr.msk.f32.mxu1 %vm592_vm2, %v567_v50 }
 0x1fe   :  { %v527_v53 = vpop.permute.xlu1 %526  ;;  %v529_v54 = vpop.permute.xlu0 %528 }
 0x1ff   :  { %v568_v57 = vsel %vm560_vm1, %v487_v51, %v527_v53  ;;  %v569_v58 = vsel %vm560_vm1, %v488_v52, %v529_v54 }
 0x200   :  { %949 = vmatmul.mubr.msk.f32.gmra.mxu1 %vm592_vm2, %v568_v57 }
 0x201   :  { %951 = vmatprep.mubr.msk.f32.mxu1 %vm592_vm2, %v569_v58 }
 0x202   :  { %v531_v61 = vpop.permute.xlu1 %530  ;;  %v533_v62 = vpop.permute.xlu0 %532 }
 0x203   :  { %v570_v63 = vsel %vm560_vm1, %v489_v59, %v531_v61  ;;  %v571_v2 = vsel %vm560_vm1, %v490_v60, %v533_v62 }
 0x204   :  { %952 = vmatmul.mubr.msk.f32.gmra.mxu1 %vm592_vm2, %v570_v63 }
 0x205   :  { %954 = vmatprep.mubr.msk.f32.mxu1 %vm592_vm2, %v571_v2 }
 0x206   :  { %v535_v5 = vpop.permute.xlu1 %534  ;;  %v537_v6 = vpop.permute.xlu0 %536 }
 0x207   :  { %v572_v7 = vsel %vm560_vm1, %v491_v3, %v535_v5  ;;  %v573_v8 = vsel %vm560_vm1, %v492_v4, %v537_v6 }
 0x208   :  { %955 = vmatmul.mubr.msk.f32.gmra.mxu1 %vm592_vm2, %v572_v7 }
 0x209   :  { %957 = vmatprep.mubr.msk.f32.mxu1 %vm592_vm2, %v573_v8 }
 0x20a   :  { %v539_v11 = vpop.permute.xlu1 %538  ;;  %v541_v40 = vpop.permute.xlu0 %540 }
 0x20b   :  { %v574_v14 = vsel %vm560_vm1, %v493_v9, %v539_v11  ;;  %v575_v36 = vsel %vm560_vm1, %v494_v10, %v541_v40 }
 0x20c   :  { %958 = vmatmul.mubr.msk.f32.gmra.mxu1 %vm592_vm2, %v574_v14 }
 0x20d   :  { %960 = vmatprep.mubr.msk.f32.mxu1 %vm592_vm2, %v575_v36 }
 0x20e   :  { %v543_v15 = vpop.permute.xlu1 %542 }
 0x20f   :  { %v576_v16 = vsel %vm560_vm1, %v495_v48, %v543_v15 }
 0x210   :  { %961 = vmatmul.mubr.msk.f32.gmra.mxu1 %vm592_vm2, %v576_v16 }
 0x2b4   :  { %v941_v55 = vpop.f32.mrf.mxu1 }
 0x2b5   :  { %v713_v17 = vadd.f32 %v941_v55, %v834_v44 }
 0x2b6   :  { %v707_v18 = vpop.f32.mrf.mxu1 }
 0x2b7   :  { %787 = vst [vmem:[#allocation3 + $0x8] sm:$0xff] %v713_v17  ;;  %v708_v0 = vadd.f32 %v834_v44, %v707_v18 }
 0x2b8   :  { %v944_v56 = vpop.f32.mrf.mxu1 }
 0x2b9   :  { %786 = vst [vmem:[#allocation3] sm:$0xff] %v708_v0  ;;  %v723_v19 = vadd.f32 %v944_v56, %v834_v44 }
 0x2ba   :  { %v717_v22 = vpop.f32.mrf.mxu1 }
 0x2bb   :  { %789 = vst [vmem:[#allocation3 + $0x18] sm:$0xff] %v723_v19  ;;  %v718_v1 = vadd.f32 %v834_v44, %v717_v22 }
 0x2bc   :  { %v947_v12 = vpop.f32.mrf.mxu1 }
 0x2bd   :  { %788 = vst [vmem:[#allocation3 + $0x10] sm:$0xff] %v718_v1  ;;  %v733_v23 = vadd.f32 %v947_v12, %v834_v44 }
 0x2be   :  { %v727_v24 = vpop.f32.mrf.mxu1 }
 0x2bf   :  { %791 = vst [vmem:[#allocation3 + $0x28] sm:$0xff] %v733_v23  ;;  %v728_v20 = vadd.f32 %v834_v44, %v727_v24 }
 0x2c0   :  { %v950_v13 = vpop.f32.mrf.mxu1 }
 0x2c1   :  { %790 = vst [vmem:[#allocation3 + $0x20] sm:$0xff] %v728_v20  ;;  %v743_v27 = vadd.f32 %v950_v13, %v834_v44 }
 0x2c2   :  { %v737_v28 = vpop.f32.mrf.mxu1 }
 0x2c3   :  { %793 = vst [vmem:[#allocation3 + $0x38] sm:$0xff] %v743_v27  ;;  %v738_v21 = vadd.f32 %v834_v44, %v737_v28 }
 0x2c4   :  { %v953_v25 = vpop.f32.mrf.mxu1 }
 0x2c5   :  { %792 = vst [vmem:[#allocation3 + $0x30] sm:$0xff] %v738_v21  ;;  %v753_v29 = vadd.f32 %v953_v25, %v834_v44 }
 0x2c6   :  { %v747_v26 = vpop.f32.mrf.mxu1 }
 0x2c7   :  { %795 = vst [vmem:[#allocation3 + $0x48] sm:$0xff] %v753_v29  ;;  %v748_v30 = vadd.f32 %v834_v44, %v747_v26 }
 0x2c8   :  { %v956_v31 = vpop.f32.mrf.mxu1 }
 0x2c9   :  { %794 = vst [vmem:[#allocation3 + $0x40] sm:$0xff] %v748_v30  ;;  %v763_v32 = vadd.f32 %v956_v31, %v834_v44 }
 0x2ca   :  { %v757_v33 = vpop.f32.mrf.mxu1 }
 0x2cb   :  { %797 = vst [vmem:[#allocation3 + $0x58] sm:$0xff] %v763_v32  ;;  %v758_v34 = vadd.f32 %v834_v44, %v757_v33 }
 0x2cc   :  { %v959_v35 = vpop.f32.mrf.mxu1 }
 0x2cd   :  { %796 = vst [vmem:[#allocation3 + $0x50] sm:$0xff] %v758_v34  ;;  %v773_v37 = vadd.f32 %v959_v35, %v834_v44 }
 0x2ce   :  { %v767_v38 = vpop.f32.mrf.mxu1 }
 0x2cf   :  { %799 = vst [vmem:[#allocation3 + $0x68] sm:$0xff] %v773_v37  ;;  %v768_v39 = vadd.f32 %v834_v44, %v767_v38 }
 0x2d0   :  { %v962_v41 = vpop.f32.mrf.mxu1 }
 0x2d1   :  { %798 = vst [vmem:[#allocation3 + $0x60] sm:$0xff] %v768_v39  ;;  %v783_v42 = vadd.f32 %v962_v41, %v834_v44 }
 0x2d2   :  { %v777_v43 = vpop.f32.mrf.mxu1 }
 0x2d3   :  { %801 = vst [vmem:[#allocation3 + $0x78] sm:$0xff] %v783_v42  ;;  %v778_v45 = vadd.f32 %v834_v44, %v777_v43 }
 0x2d5   :  { %800 = vst [vmem:[#allocation3 + $0x70] sm:$0xff] %v778_v45 }
 0x2d6   :  { %1030 = shalt.err (!%p1027_p4)
}
 0x2d7   :  { %s1045_s20 = smov 128   ;;  %s1046_s21 = smov 8  }
 0x2d8   :  { %813 = dma.vmem_to_hbm [thread:$0]  %s808_s4, 2048, %s1368_s5, [#allocation4], %s1045_s20, %s1045_s20, %s1046_s21  }
 0x2d9   :  { %1039 = dma.done.wait [#allocation4], 2048  }
 0x2da   :  { %1040 = vsyncadd [#allocation4], 4294965248 }
 0x2db   :  { %817 = vsyncpa [#allocation4], 1 }

</bundles_post_ra>
